<compile_context>
chip_gen: v7x
topology: tpu7x:2x2x1
jax: 0.10.0
libtpu: 0.0.40
codegen_flags: <defaults>
</compile_context>

<pallas_src>
import functools

import jax
import jax.numpy as jnp
from jax.experimental import pallas as pl
from jax.experimental.pallas import tpu as pltpu


def _umap_loss_kernel(to_ref, from_ref, w_ref, out_ref, *, a, b, gamma,
                      use_weights):
    """One grid step = one group of B pairs (group 0 positive, rest negative)."""
    g = pl.program_id(0)

    # Zero the resident per-lane accumulator on the first step.
    @pl.when(g == 0)
    def _init():
        out_ref[...] = jnp.zeros_like(out_ref)

    diff = to_ref[...] - from_ref[...]                        # (D, B)
    sq = jnp.sum(diff * diff, axis=0, keepdims=True)          # (1, B) sublane reduce

    # d ** b computed from the squared distance; skip sqrt / pow when possible.
    if b == 2.0:
        d_pow = sq
    elif b == 1.0:
        d_pow = jnp.sqrt(sq)
    else:
        # TODO(synk): add an epsilon guard here if this kernel is ever
        # differentiated (0 ** (b/2) has an unbounded gradient for fractional b).
        d_pow = sq ** (b * 0.5)

    e = jnp.exp(-a * d_pow)                                   # shared exp, (1, B)
    w = w_ref[...] if use_weights else 1.0

    # Positive pairs: ce = -log_prob = -log1p(e); repulsion term is zero.
    @pl.when(g == 0)
    def _positive():
        out_ref[...] += w * (-jnp.log1p(e))

    # Negative pairs: ce = gamma * (-logsigmoid(-log_prob)) = gamma * log1p(1+e).
    @pl.when(g > 0)
    def _negative():
        out_ref[...] += w * (gamma * jnp.log1p(1.0 + e))


def umap_loss_pallas(embed_to_from, edge_weights, perm_key, *,
                     negative_sample_rate=5, _a=1.0, _b=1.0,
                     repulsion_strength=1.0, parametric_embedding=False):
    B, two_d = embed_to_from.shape
    D = two_d // 2
    nsr = negative_sample_rate
    G = nsr + 1
    N = B * G

    emb_to = embed_to_from[:, :D].astype(jnp.float32)        # (B, D)
    emb_from = embed_to_from[:, D:].astype(jnp.float32)      # (B, D)

    # torch.randperm over the nsr*B virtual negative rows.  Since the tiled
    # repeat_neg[j] == emb_from[j % B], the gather reduces to indices perm % B.
    perm = jax.random.permutation(perm_key, nsr * B)
    idx_neg = perm % B                                        # (nsr*B,)

    # Lane-dense, group-major layout: (G, D, B).  Group 0 = positive pairs.
    from_rows = jnp.concatenate([emb_from, emb_from[idx_neg]], axis=0)  # (N, D)
    from_gdb = from_rows.reshape(G, B, D).transpose(0, 2, 1)            # (G, D, B)
    to_db = emb_to.T                                                    # (D, B)

    use_weights = not parametric_embedding
    if use_weights:
        # Original weights_tiled[j] == edge_weights[j % B]; per-group weight of
        # column i is just edge_weights[i], so no (N,)-sized tiling is needed.
        w_1b = edge_weights.astype(jnp.float32).reshape(1, B)
    else:
        w_1b = jnp.ones((1, B), jnp.float32)   # unused (multiply skipped)

    kernel = functools.partial(
        _umap_loss_kernel, a=float(_a), b=float(_b),
        gamma=float(repulsion_strength), use_weights=use_weights)

    grid_spec = pltpu.PrefetchScalarGridSpec(
        num_scalar_prefetch=0,
        grid=(G,),
        in_specs=[
            # Constant index_map -> 'to' embeddings stay resident in VMEM and
            # are DMA'd from HBM exactly once (no (nsr+1)x tiling in HBM).
            pl.BlockSpec((D, B), lambda g: (0, 0)),
            # Per-group block of permuted 'from' embeddings.
            pl.BlockSpec((None, D, B), lambda g: (g, 0, 0)),
            # Edge weights, resident, read once.
            pl.BlockSpec((1, B), lambda g: (0, 0)),
        ],
        out_specs=pl.BlockSpec((1, B), lambda g: (0, 0)),
    )

    partial_sums = pl.pallas_call(
        kernel,
        out_shape=jax.ShapeDtypeStruct((1, B), jnp.float32),
        grid_spec=grid_spec,
        compiler_params=pltpu.CompilerParams(
            dimension_semantics=("arbitrary",)),  # output accumulates over groups
    )(to_db, from_gdb, w_1b)

    # Tiny final cross-lane reduce + mean normalization outside the kernel.
    return jnp.sum(partial_sums) / N


def _umap_loss_ref(embed_to_from, edge_weights, perm_key, *,
                   negative_sample_rate=5, _a=1.0, _b=1.0,
                   repulsion_strength=1.0, parametric_embedding=False):
    """Pure-JAX reference mirroring the PyTorch forward (same permutation)."""
    B, two_d = embed_to_from.shape
    D = two_d // 2
    nsr = negative_sample_rate
    emb_to = embed_to_from[:, :D].astype(jnp.float32)
    emb_from = embed_to_from[:, D:].astype(jnp.float32)
    neg_to = jnp.tile(emb_to, (nsr, 1))
    repeat_neg = jnp.tile(emb_from, (nsr, 1))
    perm = jax.random.permutation(perm_key, nsr * B)
    neg_from = repeat_neg[perm]
    dist = jnp.concatenate([
        jnp.linalg.norm(emb_to - emb_from, axis=1),
        jnp.linalg.norm(neg_to - neg_from, axis=1)], axis=0)
    log_prob = jnp.log1p(jnp.exp(-_a * dist ** _b))
    p = jnp.concatenate([jnp.ones(B), jnp.zeros(B * nsr)], axis=0)
    attraction = -p * log_prob
    repellant = -(1.0 - p) * jax.nn.log_sigmoid(-log_prob)
    ce = attraction + repulsion_strength * repellant
    if not parametric_embedding:
        ce = ce * jnp.tile(edge_weights.astype(jnp.float32), nsr + 1)
    return ce.mean()


if __name__ == "__main__":
    batch_size = 8
    dim = 32
    negative_sample_rate = 5

    key = jax.random.PRNGKey(0)
    k_embed, k_w, k_perm = jax.random.split(key, 3)

    # "embed_to_from" as produced upstream: (batch, 2*dim)
    embed_to_from = jax.random.normal(k_embed, (batch_size, 2 * dim),
                                      dtype=jnp.float32)
    # deterministic synthetic edge weights (one per positive edge in the batch)
    edge_weights = jax.random.uniform(k_w, (batch_size,), minval=0.1, maxval=1.0,
                                      dtype=jnp.float32)

    loss = umap_loss_pallas(
        embed_to_from, edge_weights, k_perm,
        negative_sample_rate=negative_sample_rate,
        _a=1.0, _b=1.0, repulsion_strength=1.0, parametric_embedding=False)
    loss = jax.block_until_ready(loss)

    ref = _umap_loss_ref(
        embed_to_from, edge_weights, k_perm,
        negative_sample_rate=negative_sample_rate,
        _a=1.0, _b=1.0, repulsion_strength=1.0, parametric_embedding=False)
    ref = jax.block_until_ready(ref)

    assert jnp.allclose(loss, ref, rtol=1e-5, atol=1e-5), (loss, ref)
    print("KERNEL_OK")
</pallas_src>

<mosaic_0001>
module attributes {stable_mosaic.version = 11 : i64} {
  func.func @_umap_loss_kernel(%arg0: i32, %arg1: memref<32x8xf32, #tpu.memory_space<vmem>>, %arg2: memref<1x32x8xf32, #tpu.memory_space<vmem>>, %arg3: memref<1x8xf32, #tpu.memory_space<vmem>>, %arg4: memref<1x8xf32, #tpu.memory_space<vmem>>) attributes {dimension_semantics = [#tpu.dimension_semantics<arbitrary>], iteration_bounds = array<i64: 6>, scalar_prefetch = 0 : i64, scratch_operands = 0 : i64, tpu.core_type = #tpu.core_type<tc>, window_params = [{pipeline_mode = #tpu.pipeline_mode<synchronous>, transform_indices = @transform_0, window_bounds = array<i64: 32, 8>}, {transform_indices = @transform_1, window_bounds = array<i64: 1, 32, 8>}, {pipeline_mode = #tpu.pipeline_mode<synchronous>, transform_indices = @transform_2, window_bounds = array<i64: 1, 8>}, {pipeline_mode = #tpu.pipeline_mode<synchronous>, transform_indices = @transform_3, window_bounds = array<i64: 1, 8>}]} {
    %c0_i32 = arith.constant 0 : i32
    %0 = arith.cmpi eq, %arg0, %c0_i32 : i32
    %1 = arith.extui %0 : i1 to i32
    %c0_i32_0 = arith.constant 0 : i32
    %2 = arith.cmpi ne, %1, %c0_i32_0 : i32
    scf.if %2 {
      %cst_12 = arith.constant 0.000000e+00 : f32
      %21 = vector.broadcast %cst_12 : f32 to vector<1x8xf32>
      %c0_13 = arith.constant 0 : index
      %c0_14 = arith.constant 0 : index
      %22 = vector.load %arg4[%c0_13, %c0_14] : memref<1x8xf32, #tpu.memory_space<vmem>>, vector<1x8xf32>
      tpu.vector_store %arg4[%c0_13, %c0_14], %21 {strides = array<i32>} : memref<1x8xf32, #tpu.memory_space<vmem>>, vector<1x8xf32>,
    } else {
    }
    %c0 = arith.constant 0 : index
    %c0_1 = arith.constant 0 : index
    %3 = vector.load %arg1[%c0, %c0_1] : memref<32x8xf32, #tpu.memory_space<vmem>>, vector<32x8xf32>
    %c0_2 = arith.constant 0 : index
    %c0_3 = arith.constant 0 : index
    %c0_4 = arith.constant 0 : index
    %4 = vector.load %arg2[%c0_2, %c0_3, %c0_4] : memref<1x32x8xf32, #tpu.memory_space<vmem>>, vector<1x32x8xf32>
    %5 = vector.shape_cast %4 : vector<1x32x8xf32> to vector<32x8xf32>
    %6 = arith.subf %3, %5 : vector<32x8xf32>
    %7 = arith.mulf %6, %6 : vector<32x8xf32>
    %cst = arith.constant dense<0.000000e+00> : vector<8xf32>
    %8 = vector.multi_reduction <add>, %7, %cst [0] : vector<32x8xf32> to vector<8xf32>
    %9 = vector.shape_cast %8 : vector<8xf32> to vector<1x8xf32>
    %10 = math.sqrt %9 : vector<1x8xf32>
    %cst_5 = arith.constant -1.000000e+00 : f32
    %11 = vector.broadcast %cst_5 : f32 to vector<1x8xf32>
    %12 = arith.mulf %11, %10 : vector<1x8xf32>
    %13 = math.exp %12 : vector<1x8xf32>
    %c0_6 = arith.constant 0 : index
    %c0_7 = arith.constant 0 : index
    %14 = vector.load %arg3[%c0_6, %c0_7] : memref<1x8xf32, #tpu.memory_space<vmem>>, vector<1x8xf32>
    %c0_i32_8 = arith.constant 0 : i32
    %15 = arith.cmpi eq, %arg0, %c0_i32_8 : i32
    %16 = arith.extui %15 : i1 to i32
    %c0_i32_9 = arith.constant 0 : i32
    %17 = arith.cmpi ne, %16, %c0_i32_9 : i32
    scf.if %17 {
      %c0_12 = arith.constant 0 : index
      %c0_13 = arith.constant 0 : index
      %21 = vector.load %arg4[%c0_12, %c0_13] : memref<1x8xf32, #tpu.memory_space<vmem>>, vector<1x8xf32>
      %22 = math.log1p %13 : vector<1x8xf32>
      %cst_14 = arith.constant 0.000000e+00 : f32
      %23 = vector.broadcast %cst_14 : f32 to vector<1x8xf32>
      %24 = arith.subf %23, %22 : vector<1x8xf32>
      %25 = arith.mulf %14, %24 : vector<1x8xf32>
      %26 = arith.addf %21, %25 : vector<1x8xf32>
      %c0_15 = arith.constant 0 : index
      %c0_16 = arith.constant 0 : index
      %27 = vector.load %arg4[%c0_15, %c0_16] : memref<1x8xf32, #tpu.memory_space<vmem>>, vector<1x8xf32>
      tpu.vector_store %arg4[%c0_15, %c0_16], %26 {strides = array<i32>} : memref<1x8xf32, #tpu.memory_space<vmem>>, vector<1x8xf32>,
    } else {
    }
    %c0_i32_10 = arith.constant 0 : i32
    %18 = arith.cmpi sgt, %arg0, %c0_i32_10 : i32
    %19 = arith.extui %18 : i1 to i32
    %c0_i32_11 = arith.constant 0 : i32
    %20 = arith.cmpi ne, %19, %c0_i32_11 : i32
    scf.if %20 {
      %c0_12 = arith.constant 0 : index
      %c0_13 = arith.constant 0 : index
      %21 = vector.load %arg4[%c0_12, %c0_13] : memref<1x8xf32, #tpu.memory_space<vmem>>, vector<1x8xf32>
      %cst_14 = arith.constant 1.000000e+00 : f32
      %22 = vector.broadcast %cst_14 : f32 to vector<1x8xf32>
      %23 = arith.addf %22, %13 : vector<1x8xf32>
      %24 = math.log1p %23 : vector<1x8xf32>
      %cst_15 = arith.constant 1.000000e+00 : f32
      %25 = vector.broadcast %cst_15 : f32 to vector<1x8xf32>
      %26 = arith.mulf %25, %24 : vector<1x8xf32>
      %27 = arith.mulf %14, %26 : vector<1x8xf32>
      %28 = arith.addf %21, %27 : vector<1x8xf32>
      %c0_16 = arith.constant 0 : index
      %c0_17 = arith.constant 0 : index
      %29 = vector.load %arg4[%c0_16, %c0_17] : memref<1x8xf32, #tpu.memory_space<vmem>>, vector<1x8xf32>
      tpu.vector_store %arg4[%c0_16, %c0_17], %28 {strides = array<i32>} : memref<1x8xf32, #tpu.memory_space<vmem>>, vector<1x8xf32>,
    } else {
    }
    return
  }
  func.func @transform_0(%arg0: i32) -> (i32, i32) {
    %c0_i32 = arith.constant 0 : i32
    %c0_i32_0 = arith.constant 0 : i32
    %c0_i32_1 = arith.constant 0 : i32
    return %c0_i32, %c0_i32_0 : i32, i32
  }
  func.func @transform_1(%arg0: i32) -> (i32, i32, i32) {
    %c0_i32 = arith.constant 0 : i32
    %c0_i32_0 = arith.constant 0 : i32
    %c0_i32_1 = arith.constant 0 : i32
    return %arg0, %c0_i32, %c0_i32_0 : i32, i32, i32
  }
  func.func @transform_2(%arg0: i32) -> (i32, i32) {
    %c0_i32 = arith.constant 0 : i32
    %c0_i32_0 = arith.constant 0 : i32
    %c0_i32_1 = arith.constant 0 : i32
    return %c0_i32, %c0_i32_0 : i32, i32
  }
  func.func @transform_3(%arg0: i32) -> (i32, i32) {
    %c0_i32 = arith.constant 0 : i32
    %c0_i32_0 = arith.constant 0 : i32
    %c0_i32_1 = arith.constant 0 : i32
    return %c0_i32, %c0_i32_0 : i32, i32
  }
}

</mosaic_0001>

<bundles_post_ra>
// kernel: tpu_custom_call.1
= control target key start
LH: loop header
LB: loop body
LE: loop exit
PB: predicated region body
PF: predicated region fallthrough
CT: control target
= control target key end

     0   :  { %8 = vsyncpa [#allocation3], 0  ;;  %s385_s12 = smov 0   ;;  %s451_s0 = inlined_call_operand.vmem [shape: f32[32,8], index: 0, kind: input, shape index: {}]   ;;  %s452_s1 = inlined_call_operand.vmem [shape: f32[6,32,8], index: 1, kind: input, shape index: {}]   ;;  %s453_s2 = inlined_call_operand.vmem [shape: f32[1,8], index: 2, kind: input, shape index: {}]   ;;  %s454_s3 = inlined_call_operand.hbm [shape: f32[1,8], index: 3, kind: output, shape index: {}]  }
   0x1 LB: > { %s391_s13 = sadd.s32 4294967295, %s361_s12   ;;  %p290_p0 = scmp.ge.s32.totalorder %s361_s12, 1  ;;  %s361_s12 = sphi %s385_s12, %s14_s12  }
   0x2   : > { %p133_p1 = scmp.lt.s32.totalorder %s361_s12, 7 }
   0x4   : > { %p134_p2 = pnand %p290_p0, %p133_p1 }
   0x5   : > { %p152_p3 = scmp.lt.s32.totalorder (!%p134_p2), %s391_s13, 5  ;;  %p293_p4 = scmp.ne.s32.totalorder (!%p134_p2), %s391_s13, 0 }
   0x6   : > { %137 = sbr.rel (%p134_p2) target bundleno = 148 (0x94), region = 32 }
   0xd   : > { %s153_s14 = scalar_select %p152_p3, %s391_s13, 5 }
   0xe   : > { %160 = sbr.rel (%p293_p4) target bundleno = 21 (0x15), region = 36  ;;  %vm161_vm0 = vcmask (!%p293_p4), 57344   ;;  %v363_v0 = vmov (!%p293_p4), 0.0  }
   0xf   : > { %s300_s15 = sshll.u32 %s153_s14, 5  ;;  %162 = vst.msk [vmem:[#allocation2] sm:$0x1] (!%p293_p4), %vm161_vm0, %v363_v0 }
  0x10   : > { %s156_s18 = scalar_lea.vmem %s452_s1, %s300_s15 }
  0x15 PF: > { %v163_v1 = vld [vmem:[%s451_s0] sm:$0xff]  ;;  %v164_v2 = vld [vmem:[%s451_s0 + $0x8] sm:$0xff]  ;;  %v165_v3 = vld [vmem:[%s451_s0 + $0x10] sm:$0xff]  ;;  %vm179_vm1 = vcmask 64512   ;;  %vm220_vm5 = vcmask (!%p293_p4), 57344  }
  0x16   : > { %v166_v4 = vld [vmem:[%s451_s0 + $0x18] sm:$0xff]  ;;  %v167_v5 = vld [vmem:[%s156_s18] sm:$0xff]  ;;  %v168_v6 = vld [vmem:[%s156_s18 + $0x8] sm:$0xff] }
  0x17   : > { %v169_v7 = vld [vmem:[%s156_s18 + $0x10] sm:$0xff]  ;;  %v170_v8 = vld [vmem:[%s156_s18 + $0x18] sm:$0xff]  ;;  %v171_v9 = vsub.f32 %v163_v1, %v167_v5  ;;  %v172_v10 = vsub.f32 %v164_v2, %v168_v6  ;;  %v418_v11 = vld [vmem:[%s453_s2] sm:$0x1] }
  0x18   : > { %v173_v12 = vsub.f32 %v165_v3, %v169_v7  ;;  %v174_v13 = vsub.f32 %v166_v4, %v170_v8  ;;  %v207_v48 = vld [vmem:[#allocation2] sm:$0x1] (!%p293_p4) }
  0x19   : > { %v175_v14 = vmul.f32 %v171_v9, %v171_v9  ;;  %v176_v15 = vmul.f32 %v172_v10, %v172_v10 }
  0x1a   : > { %v177_v16 = vmul.f32 %v173_v12, %v173_v12  ;;  %v178_v17 = vmul.f32 %v174_v13, %v174_v13 }
  0x1b   : > { %v180_v18 = vsel %vm179_vm1, %v175_v14, 0.0  ;;  %v181_v19 = vsel %vm179_vm1, %v176_v15, 0.0 }
  0x1c   : > { %v182_v20 = vadd.f32 %v181_v19, %v180_v18  ;;  %v183_v21 = vsel %vm179_vm1, %v177_v16, 0.0  ;;  %v185_v22 = vsel %vm179_vm1, %v178_v17, 0.0 }
  0x1e   : > { %v184_v23 = vadd.f32 %v183_v21, %v182_v20 }
  0x20   : > { %v186_v24 = vadd.f32 %v185_v22, %v184_v23 }
  0x22   : > { %v187_v25 = vrot.slane %v186_v24, 4 }
  0x24   : > { %v188_v26 = vadd.f32 %v187_v25, %v186_v24 }
  0x26   : > { %v189_v27 = vrot.slane %v188_v26, 2 }
  0x28   : > { %v190_v28 = vadd.f32 %v189_v27, %v188_v26 }
  0x2a   : > { %v191_v29 = vrot.slane %v190_v28, 1 }
  0x2c   : > { %v192_v30 = vadd.f32 %v191_v29, %v190_v28 }
  0x2e   : > { %317 = vrsqrt.f32 %v192_v30  ;;  %vm195_vm2 = vcmp.eq.f32.partialorder %v192_v30, inf  ;;  %v198_v32 = vand.u32 2147483648, %v192_v30  ;;  %vm197_vm3 = vcmp.eq.f32.partialorder %v192_v30, 0.0 }
  0x38   : > { %v318_v31 = vpop.eup %317 }
  0x39   : > { %v194_v33 = vmul.f32 %v318_v31, %v192_v30 }
  0x3b   : > { %v196_v34 = vsel %vm195_vm2, %v192_v30, %v194_v33 }
  0x3c   : > { %v199_v35 = vsel %vm197_vm3, %v198_v32, %v196_v34 }
  0x3d   : > { %v200_v36 = vmul.f32 -1.0, %v199_v35 }
  0x3f   : > { %v201_v37 = vmul.f32 1.442695, %v200_v36 }
  0x41   : > { %319 = vpow2.f32 %v201_v37 }
  0x45   : > { %206 = sbr.rel (%p293_p4) target bundleno = 99 (0x63), region = 40 }
  0x4b   : > { %v320_v38 = vpop.eup %319 }
  0x4c   : > { %v208_v39 = vadd.f32 1.0, %v320_v38  ;;  %v211_v40 = vmul.f32 -0.5, %v320_v38  ;;  %v214_v42 = vand.u32 2147483647, %v320_v38 }
  0x4e   : > { %321 = vlog2.f32 %v208_v39  ;;  %v212_v41 = vadd.f32 1.0, %v211_v40  ;;  %vm215_vm4 = vcmp.lt.f32.partialorder %v214_v42, 0.0004427343 }
  0x50   : > { %v213_v43 = vmul.f32 %v320_v38, %v212_v41 }
  0x58   : > { %v322_v44 = vpop.eup %321 }
  0x59   : > { %v210_v45 = vmul.f32 0.6931472, %v322_v44 }
  0x5b   : > { %v216_v46 = vsel %vm215_vm4, %v213_v43, %v210_v45 }
  0x5c   : > { %v217_v47 = vsub.f32 0.0, %v216_v46 }
  0x5e   : > { %v218_v49 = vmul.f32 %v217_v47, %v418_v11 }
  0x60   : > { %v219_v50 = vadd.f32 %v218_v49, %v207_v48 }
  0x62   : > { %221 = vst.msk [vmem:[#allocation2] sm:$0x1] %vm220_vm5, %v219_v50 }
  0x63 PF: > { %p295_p5 = scmp.le.s32.totalorder %s391_s13, 0 }
  0x64   : > { %v227_v51 = vadd.f32 (!%p295_p5), 1.0, %v320_v38  ;;  %vm239_vm7 = vcmask (!%p295_p5), 57344  }
  0x65   : > { %225 = sbr.rel (%p295_p5) target bundleno = 123 (0x7b), region = 44 }
  0x66   : > { %v228_v52 = vadd.f32 (!%p295_p5), 1.0, %v227_v51  ;;  %v231_v53 = vmul.f32 (!%p295_p5), -0.5, %v227_v51  ;;  %v234_v55 = vand.u32 (!%p295_p5), 2147483647, %v227_v51 }
  0x68   : > { %323 = vlog2.f32 (!%p295_p5), %v228_v52  ;;  %v232_v54 = vadd.f32 (!%p295_p5), 1.0, %v231_v53  ;;  %vm235_vm6 = vcmp.lt.f32.partialorder (!%p295_p5), %v234_v55, 0.0004427343 }
  0x69   : > { %v226_v59 = vld [vmem:[#allocation2] sm:$0x1] (!%p295_p5) }
  0x6a   : > { %v233_v56 = vmul.f32 (!%p295_p5), %v232_v54, %v227_v51 }
  0x72   : > { %v324_v57 = vpop.eup %323 }
  0x73   : > { %v230_v58 = vmul.f32 0.6931472, %v324_v57 }
  0x75   : > { %v236_v60 = vsel %vm235_vm6, %v233_v56, %v230_v58 }
  0x76   : > { %v237_v61 = vmul.f32 %v236_v60, %v418_v11 }
  0x78   : > { %v238_v62 = vadd.f32 %v237_v61, %v226_v59 }
  0x7a   : > { %240 = vst.msk [vmem:[#allocation2] sm:$0x1] %vm239_vm7, %v238_v62 }
  0x7b PF: > { %p305_p6 = scmp.eq.s32.totalorder %s391_s13, 5  ;;  %s364_s29 = smov [#allocation2]  }
  0x7c   : > { %s248_s30 = sshll.u32 %s364_s29, 4  ;;  %s249_s30 = int_to_ptr.vmem [resolvable:$true] %s248_s30 }
  0x7d   : > { %s325_s4 = scalar_lea.vmem %s249_s30, 16  ;;  %s331_s5 = scalar_lea.vmem %s249_s30, 32 }
  0x7e   : > { %p326_p7 = scmp.ne.s32.totalorder %s249_s30, %s325_s4  ;;  %p332_p10 = scmp.lt.s32.totalorder %s249_s30, %s249_s30 }
  0x7f   : > { %p333_p11 = scmp.lt.s32.totalorder %s331_s5, %s325_s4 }
  0x80   : > { %p327_p8 = pnand %p326_p7, %p305_p6 }
  0x81   : > { %p334_p12 = por %p333_p11, %p332_p10 }
  0x82   : > { %p328_p9 = pneg %p327_p8 }
  0x84   : > { %p335_p13 = pnand %p334_p12, %p328_p9 }
  0x86   : > { %338 = shalt.err (!%p335_p13)
}
  0x87   : > { %s339_s8 = scalar_lea.hbm %s454_s3, 16 }
  0x88   : > { %p340_p0 = scmp.ne.s32.totalorder %s454_s3, %s339_s8  ;;  %p345_p3 = scmp.lt.u32.totalorder %s339_s8, %s454_s3 }
  0x8a   : > { %p341_p1 = pnand %p340_p0, %p305_p6 }
  0x8c   : > { %p342_p2 = pneg %p341_p1 }
  0x8e   : > { %p347_p4 = pnand %p345_p3, %p342_p2 }
  0x90   : > { %350 = shalt.err (!%p347_p4)
}
  0x91   : > { %302 = dma.vmem_to_hbm [thread:$0]  (%p305_p6), %s249_s30, 16, %s454_s3, [#allocation3]  }
  0x92   : > { %356 = dma.done.wait (%p305_p6), [#allocation3], 16  }
  0x93   : > { %358 = vsyncadd (%p305_p6), [#allocation3], 4294967280 }
  0x94 PF: > { %s14_s12 = sadd.s32 1, %s361_s12  }
  0x95   : > { %p11_p5 = scmp.ge.s32.totalorder %s14_s12, 8  }
  0x97   :  { %13 = sbr.rel (!%p11_p5) target bundleno = 1 (0x1), region = 71 }
  0x9e   :  { %261 = vsyncpa [#allocation3], 1 }
  0x9f   :  { %263 = vsyncpa [#allocation3 + $0x1], 1 }

</bundles_post_ra>
